<compile_context>
chip_gen: v7x
topology: tpu7x:2x2x1
jax: 0.10.0
libtpu: 0.0.40
codegen_flags: <defaults>
</compile_context>

<pallas_src>
import functools
from typing import NamedTuple

import jax
import jax.numpy as jnp
from jax.experimental import pallas as pl
from jax.experimental.pallas import tpu as pltpu


def _round_up(x, m):
    return ((x + m - 1) // m) * m


def _tile_config():
    """Per-generation tile ceilings, scoped-VMEM budget and core count."""
    try:
        kind = jax.devices()[0].device_kind.lower()
    except Exception:
        kind = ""
    if "v5" in kind:
        # v5e: 1 TC, ~820 GB/s HBM. 4 MiB weight tiles keep per-step overhead
        # under ~10% of the DMA time; footprint ~20 MiB << 64 MiB budget.
        return dict(tm_max=512, tn_max=1024, tk_max=1024,
                    vmem_bytes=64 * 1024 * 1024, num_cores=1)
    if "v7" in kind:
        # v7x: 2 TCs, 3.2 TB/s HBM but only 64 MiB VMEM per core -> keep
        # headroom; dropping the acc scratch pays for the 1024-wide tiles.
        return dict(tm_max=512, tn_max=1024, tk_max=1024,
                    vmem_bytes=48 * 1024 * 1024, num_cores=2)
    # v6e (default): 1 TC, 128 MiB VMEM.
    return dict(tm_max=512, tn_max=1024, tk_max=1024,
                vmem_bytes=100 * 1024 * 1024, num_cores=1)


class _Plan(NamedTuple):
    bp: int      # padded batch
    kpad: int    # padded n_in
    npad: int    # padded n_units
    tm: int
    tn: int
    tk: int
    vmem_bytes: int


def _make_plan(batch, n_in, n_units, lhs_itemsize, tile_maxes=None):
    cfg = _tile_config()
    if tile_maxes:
        cfg.update(tile_maxes)

    # Sublane quantum for the lhs dtype: f32 -> 8 rows, bf16 -> 16, int8 -> 32.
    sublane = 8 * max(1, 4 // int(lhs_itemsize))
    bp0 = _round_up(batch, sublane)
    tm = min(cfg["tm_max"], bp0)
    bp = _round_up(bp0, tm)

    np0 = _round_up(n_units, 128)
    tn = min(cfg["tn_max"], np0)
    # v7x core balance: if the batch fits one i tile, make sure there are at
    # least num_cores tiles along j so both TensorCores get work.
    if cfg["num_cores"] > 1 and bp // tm == 1 and np0 >= cfg["num_cores"] * 128:
        tn = min(tn, (np0 // cfg["num_cores"]) // 128 * 128)
    npad = _round_up(np0, tn)

    kp0 = _round_up(n_in, 128)
    tk = min(cfg["tk_max"], kp0)
    kpad = _round_up(kp0, tk)

    return _Plan(bp=bp, kpad=kpad, npad=npad, tm=tm, tn=tn, tk=tk,
                 vmem_bytes=cfg["vmem_bytes"])


def _output_layer_kernel(bu_err_ref, w_ref, state_ref, out_ref, *, eps_2):
    k = pl.program_id(2)

    @pl.when(k == 0)
    def _():
        out_ref[...] = jnp.zeros_like(out_ref)

    # MXU matmul, f32 accumulation straight into the resident f32 out block.
    out_ref[...] += jnp.dot(bu_err_ref[...], w_ref[...],
                            preferred_element_type=jnp.float32)

    # Elementwise epilogue (VPU), once, on the last reduction step.
    @pl.when(k == pl.num_programs(2) - 1)
    def _():
        out_ref[...] = (
            jnp.maximum(jnp.float32(eps_2), state_ref[...].astype(jnp.float32))
            * out_ref[...])


def _build_padded_call(plan, eps_2):
    """pallas_call over already-padded (bp,kpad)/(kpad,npad)/(bp,npad) arrays."""
    tm, tn, tk = plan.tm, plan.tn, plan.tk
    grid = (plan.bp // tm, plan.npad // tn, plan.kpad // tk)
    kernel = functools.partial(_output_layer_kernel, eps_2=float(eps_2))
    return pl.pallas_call(
        kernel,
        out_shape=jax.ShapeDtypeStruct((plan.bp, plan.npad), jnp.float32),
        grid_spec=pltpu.PrefetchScalarGridSpec(
            num_scalar_prefetch=0,
            grid=grid,
            in_specs=[
                pl.BlockSpec((tm, tk), lambda i, j, k: (i, k)),   # bu_err
                pl.BlockSpec((tk, tn), lambda i, j, k: (k, j)),   # weights
                pl.BlockSpec((tm, tn), lambda i, j, k: (i, j)),   # state (k-invariant)
            ],
            out_specs=pl.BlockSpec((tm, tn), lambda i, j, k: (i, j)),
        ),
        # New state overwrites the padded old-state HBM buffer in place.
        input_output_aliases={2: 0},
        compiler_params=pltpu.CompilerParams(
            dimension_semantics=("parallel", "parallel", "arbitrary"),
            vmem_limit_bytes=plan.vmem_bytes,
        ),
    )


# Below this many weight bytes the launch / per-step overhead dominates; let
# XLA fuse matmul + max*mul instead.
_PALLAS_MIN_WEIGHT_BYTES = 256 * 1024


def output_layer_forward(bu_err, bu_weights_normalized, state, eps_2=1e-4,
                         *, force_pallas=False, tile_maxes=None):
    """Standalone OutputLayer.forward: maximum(eps_2, state) * (bu_err @ W).

    Generic (pads per call).  For repeated use prefer OutputLayerPallas, which
    caches the padded/cast weights and keeps the state padded persistently.
    """
    batch_size, n_in = bu_err.shape
    k_dim, n_units = bu_weights_normalized.shape
    assert k_dim == n_in
    assert state.shape == (batch_size, n_units)

    w_bytes = bu_weights_normalized.size * bu_weights_normalized.dtype.itemsize
    if not force_pallas and w_bytes < _PALLAS_MIN_WEIGHT_BYTES:
        pred_err = jnp.dot(bu_err, bu_weights_normalized,
                           preferred_element_type=jnp.float32)
        return (jnp.maximum(jnp.float32(eps_2), state.astype(jnp.float32))
                * pred_err).astype(jnp.float32)

    plan = _make_plan(batch_size, n_in, n_units,
                      jnp.dtype(bu_err.dtype).itemsize, tile_maxes)
    bu_err_p = jnp.pad(bu_err, ((0, plan.bp - batch_size),
                                (0, plan.kpad - n_in)))
    w_p = jnp.pad(bu_weights_normalized,
                  ((0, plan.kpad - n_in), (0, plan.npad - n_units)))
    state_p = jnp.pad(state.astype(jnp.float32),
                      ((0, plan.bp - batch_size), (0, plan.npad - n_units)))
    out_p = _build_padded_call(plan, eps_2)(bu_err_p, w_p, state_p)
    return out_p[:batch_size, :n_units]


class OutputLayerPallas:
    """JAX/Pallas port of torch_pcdim.layers.OutputLayer (fused forward)."""

    def __init__(self, n_in, n_units, batch_size=1, bu_weights=None,
                 td_weights=None, eps_2=1e-4, key=None,
                 compute_dtype=jnp.bfloat16):
        self.n_in = n_in
        self.n_units = n_units
        self.batch_size = batch_size
        self.eps_2 = float(eps_2)
        self.clamped = False
        self.compute_dtype = compute_dtype

        if key is None:
            key = jax.random.PRNGKey(0)
        k_bu, k_td = jax.random.split(key)

        if bu_weights is None:
            bu_weights = jax.random.uniform(
                k_bu, (n_in, n_units), dtype=jnp.float32) * 0.1
        if td_weights is None:
            td_weights = jax.random.uniform(
                k_td, (n_units, n_in), dtype=jnp.float32) * 0.1
        bu_weights = jnp.asarray(bu_weights, jnp.float32)
        td_weights = jnp.asarray(td_weights, jnp.float32)
        assert bu_weights.shape == (n_in, n_units)
        assert td_weights.shape == (n_units, n_in)
        self.bu_weights = bu_weights
        self.td_weights = td_weights

        self.normalizer = 1.0 / (jnp.sum(bu_weights, axis=0, keepdims=True) + 1.0)
        # Exact f32 copy kept for reference / backward / re-derivation.
        self.bu_weights_normalized = bu_weights * self.normalizer

        self._rebuild_cache(reset_state=True)

    # -- caching: padded+cast weights, persistent padded state, jitted call --
    def _refresh_padded_weights(self):
        p = self._plan
        self._w_p = jnp.pad(
            self.bu_weights_normalized,
            ((0, p.kpad - self.n_in), (0, p.npad - self.n_units)),
        ).astype(self.compute_dtype)

    def _rebuild_cache(self, reset_state):
        self._plan = _make_plan(self.batch_size, self.n_in, self.n_units,
                                jnp.dtype(self.compute_dtype).itemsize)
        p = self._plan
        self._refresh_padded_weights()
        if reset_state:
            self._state_p = jnp.zeros((p.bp, p.npad), jnp.float32).at[
                :self.batch_size, :self.n_units].set(1.0 / self.n_units)

        call = _build_padded_call(p, self.eps_2)
        batch, n_in, cdt = self.batch_size, self.n_in, self.compute_dtype

        def fwd(bu_err, w_p, state_p):
            bu_p = jnp.pad(bu_err.astype(cdt),
                           ((0, p.bp - batch), (0, p.kpad - n_in)))
            return call(bu_p, w_p, state_p)

        # Donate the padded state so the aliased kernel output reuses it.
        self._fwd = jax.jit(fwd, donate_argnums=(2,))

    # ------------------------------ API ------------------------------------
    @property
    def state(self):
        return self._state_p[:self.batch_size, :self.n_units]

    def reset(self, batch_size=None):
        if batch_size is not None:
            self.batch_size = batch_size
        self._rebuild_cache(reset_state=True)

    def forward(self, bu_err):
        if not self.clamped:
            assert bu_err.shape == (self.batch_size, self.n_in)
            self._state_p = self._fwd(bu_err, self._w_p, self._state_p)
        return self.state

    def backward(self, normalize=False):
        # Plain XLA matmul; not the fused forward hot path.
        return self.state @ self.td_weights

    def clamp(self, state):
        p = self._plan
        self._state_p = jnp.zeros((p.bp, p.npad), jnp.float32).at[
            :self.batch_size, :self.n_units].set(
                jnp.asarray(state, jnp.float32))
        self.clamped = True

    def release_clamp(self):
        self.clamped = False

    def train_weights(self, bu_err, lr=0.01):
        # TODO(synk): Hebbian weight update kept in plain JAX (not a forward
        # hot path); it refreshes the cached padded weights afterwards.
        state = self.state
        delta = state.T @ jnp.asarray(bu_err, jnp.float32)
        delta = delta / jnp.maximum(
            jnp.float32(self.eps_2), state.sum(axis=0, keepdims=True)).T
        delta = 1.0 + lr * (delta - 1.0)
        td_weights = jnp.clip(self.td_weights * delta, 0.0, 1.0)
        self.td_weights = td_weights
        self.bu_weights = td_weights.T
        self.normalizer = 1.0 / jnp.sum(self.bu_weights, axis=0, keepdims=True)
        self.bu_weights_normalized = self.bu_weights * self.normalizer
        self._refresh_padded_weights()


if __name__ == "__main__":
    # --- Test 1: class (default bf16 weights/inputs, f32 accumulate), tiny
    # shapes exercise the padding path; two steps exercise the persistent
    # padded-state in-place update. ------------------------------------------
    batch_size, n_in, n_units = 2, 16, 32
    layer = OutputLayerPallas(n_in=n_in, n_units=n_units,
                              batch_size=batch_size, key=jax.random.PRNGKey(0))
    bu_err = jax.random.uniform(jax.random.PRNGKey(42), (batch_size, n_in),
                                dtype=jnp.float32)
    init_state = layer.state
    new_state = jax.block_until_ready(layer.forward(bu_err))
    assert new_state.shape == (batch_size, n_units)

    # Matched-dtype reference (same bf16 operands, f32 accumulation).
    pred_bf = jnp.dot(bu_err.astype(jnp.bfloat16),
                      layer.bu_weights_normalized.astype(jnp.bfloat16),
                      preferred_element_type=jnp.float32)
    ref_bf = jnp.maximum(jnp.float32(layer.eps_2), init_state) * pred_bf
    assert jnp.allclose(new_state, ref_bf, atol=1e-4, rtol=1e-3)

    # Loose check against the full-f32 PyTorch-style reference (bf16 error).
    pred_f32 = jnp.dot(bu_err, layer.bu_weights_normalized,
                       preferred_element_type=jnp.float32,
                       precision=jax.lax.Precision.HIGHEST)
    ref_f32 = jnp.maximum(jnp.float32(layer.eps_2), init_state) * pred_f32
    assert jnp.allclose(new_state, ref_f32, atol=1e-3, rtol=3e-2)

    # Second step (state update chaining).
    prev_state = layer.state
    bu_err_b = jax.random.uniform(jax.random.PRNGKey(7), (batch_size, n_in),
                                  dtype=jnp.float32)
    new_state2 = jax.block_until_ready(layer.forward(bu_err_b))
    pred_b = jnp.dot(bu_err_b.astype(jnp.bfloat16),
                     layer.bu_weights_normalized.astype(jnp.bfloat16),
                     preferred_element_type=jnp.float32)
    ref_b = jnp.maximum(jnp.float32(layer.eps_2), prev_state) * pred_b
    assert jnp.allclose(new_state2, ref_b, atol=1e-4, rtol=1e-3)

    # --- Test 2: standalone f32 path, multi-block grid (padding + k-accum)
    # with forced small tiles. ------------------------------------------------
    b2, k2, n2 = 10, 200, 300
    kx, kw, ks = jax.random.split(jax.random.PRNGKey(1), 3)
    bu_err2 = jax.random.uniform(kx, (b2, k2), dtype=jnp.float32)
    w2 = jax.random.uniform(kw, (k2, n2), dtype=jnp.float32) * 0.1
    state2 = jax.random.uniform(ks, (b2, n2), dtype=jnp.float32)
    out2 = jax.block_until_ready(
        output_layer_forward(bu_err2, w2, state2, 1e-4, force_pallas=True,
                             tile_maxes=dict(tm_max=8, tn_max=128, tk_max=128)))
    pred2 = jnp.dot(bu_err2, w2, preferred_element_type=jnp.float32,
                    precision=jax.lax.Precision.HIGHEST)
    ref2 = jnp.maximum(jnp.float32(1e-4), state2) * pred2
    assert out2.shape == (b2, n2)
    assert jnp.allclose(out2, ref2, atol=1e-4, rtol=1e-3)

    # --- Test 3: tiny default dispatch uses the plain-XLA fallback. ----------
    out3 = jax.block_until_ready(
        output_layer_forward(bu_err, layer.bu_weights_normalized,
                             init_state, layer.eps_2))
    assert jnp.allclose(out3, ref_f32, atol=1e-4, rtol=1e-3)

    print("KERNEL_OK")
</pallas_src>

<mosaic_0001>
module attributes {stable_mosaic.version = 11 : i64} {
  func.func @_output_layer_kernel(%arg0: i32, %arg1: i32, %arg2: i32, %arg3: memref<16x128xbf16, #tpu.memory_space<vmem>>, %arg4: memref<128x128xbf16, #tpu.memory_space<vmem>>, %arg5: memref<16x128xf32, #tpu.memory_space<vmem>>, %arg6: memref<16x128xf32, #tpu.memory_space<vmem>>) attributes {dimension_semantics = [#tpu.dimension_semantics<parallel>, #tpu.dimension_semantics<parallel>, #tpu.dimension_semantics<arbitrary>], iteration_bounds = array<i64: 1, 1, 1>, scalar_prefetch = 0 : i64, scratch_operands = 0 : i64, tpu.core_type = #tpu.core_type<tc>, window_params = [{transform_indices = @transform_0, window_bounds = array<i64: 16, 128>}, {transform_indices = @transform_1, window_bounds = array<i64: 128, 128>}, {transform_indices = @transform_2, window_bounds = array<i64: 16, 128>}, {transform_indices = @transform_3, window_bounds = array<i64: 16, 128>}]} {
    %c0_i32 = arith.constant 0 : i32
    %0 = arith.cmpi eq, %arg2, %c0_i32 : i32
    %1 = arith.extui %0 : i1 to i32
    %c0_i32_0 = arith.constant 0 : i32
    %2 = arith.cmpi ne, %1, %c0_i32_0 : i32
    scf.if %2 {
      %cst_10 = arith.constant 0.000000e+00 : f32
      %12 = vector.broadcast %cst_10 : f32 to vector<16x128xf32>
      %c0_11 = arith.constant 0 : index
      %c0_12 = arith.constant 0 : index
      %13 = vector.load %arg6[%c0_11, %c0_12] : memref<16x128xf32, #tpu.memory_space<vmem>>, vector<16x128xf32>
      tpu.vector_store %arg6[%c0_11, %c0_12], %12 {strides = array<i32>} : memref<16x128xf32, #tpu.memory_space<vmem>>, vector<16x128xf32>,
    } else {
    }
    %c0 = arith.constant 0 : index
    %c0_1 = arith.constant 0 : index
    %3 = vector.load %arg6[%c0, %c0_1] : memref<16x128xf32, #tpu.memory_space<vmem>>, vector<16x128xf32>
    %c0_2 = arith.constant 0 : index
    %c0_3 = arith.constant 0 : index
    %4 = vector.load %arg3[%c0_2, %c0_3] : memref<16x128xbf16, #tpu.memory_space<vmem>>, vector<16x128xbf16>
    %c0_4 = arith.constant 0 : index
    %c0_5 = arith.constant 0 : index
    %5 = vector.load %arg4[%c0_4, %c0_5] : memref<128x128xbf16, #tpu.memory_space<vmem>>, vector<128x128xbf16>
    %cst = arith.constant dense<0.000000e+00> : vector<16x128xf32>
    %6 = tpu.matmul %4, %5, %cst {dimension_numbers = #tpu.dot_dimension_numbers<[1], [0], [0], [1], [0, 0, 1, 1], [], []>} : vector<16x128xbf16>, vector<128x128xbf16>, vector<16x128xf32> -> vector<16x128xf32>
    %7 = arith.addf %3, %6 : vector<16x128xf32>
    %c0_6 = arith.constant 0 : index
    %c0_7 = arith.constant 0 : index
    %8 = vector.load %arg6[%c0_6, %c0_7] : memref<16x128xf32, #tpu.memory_space<vmem>>, vector<16x128xf32>
    tpu.vector_store %arg6[%c0_6, %c0_7], %7 {strides = array<i32>} : memref<16x128xf32, #tpu.memory_space<vmem>>, vector<16x128xf32>,
    %c0_i32_8 = arith.constant 0 : i32
    %9 = arith.cmpi eq, %arg2, %c0_i32_8 : i32
    %10 = arith.extui %9 : i1 to i32
    %c0_i32_9 = arith.constant 0 : i32
    %11 = arith.cmpi ne, %10, %c0_i32_9 : i32
    scf.if %11 {
      %c0_10 = arith.constant 0 : index
      %c0_11 = arith.constant 0 : index
      %12 = vector.load %arg5[%c0_10, %c0_11] : memref<16x128xf32, #tpu.memory_space<vmem>>, vector<16x128xf32>
      %cst_12 = arith.constant 9.99999974E-5 : f32
      %13 = vector.broadcast %cst_12 : f32 to vector<16x128xf32>
      %14 = arith.maximumf %13, %12 : vector<16x128xf32>
      %c0_13 = arith.constant 0 : index
      %c0_14 = arith.constant 0 : index
      %15 = vector.load %arg6[%c0_13, %c0_14] : memref<16x128xf32, #tpu.memory_space<vmem>>, vector<16x128xf32>
      %16 = arith.mulf %14, %15 : vector<16x128xf32>
      %c0_15 = arith.constant 0 : index
      %c0_16 = arith.constant 0 : index
      %17 = vector.load %arg6[%c0_15, %c0_16] : memref<16x128xf32, #tpu.memory_space<vmem>>, vector<16x128xf32>
      tpu.vector_store %arg6[%c0_15, %c0_16], %16 {strides = array<i32>} : memref<16x128xf32, #tpu.memory_space<vmem>>, vector<16x128xf32>,
    } else {
    }
    return
  }
  func.func @transform_0(%arg0: i32, %arg1: i32, %arg2: i32) -> (i32, i32) {
    %c0_i32 = arith.constant 0 : i32
    return %arg0, %arg2 : i32, i32
  }
  func.func @transform_1(%arg0: i32, %arg1: i32, %arg2: i32) -> (i32, i32) {
    %c0_i32 = arith.constant 0 : i32
    return %arg2, %arg1 : i32, i32
  }
  func.func @transform_2(%arg0: i32, %arg1: i32, %arg2: i32) -> (i32, i32) {
    %c0_i32 = arith.constant 0 : i32
    return %arg0, %arg1 : i32, i32
  }
  func.func @transform_3(%arg0: i32, %arg1: i32, %arg2: i32) -> (i32, i32) {
    %c0_i32 = arith.constant 0 : i32
    return %arg0, %arg1 : i32, i32
  }
}

</mosaic_0001>

<bundles_post_ra>
// kernel: fwd.1
= control target key start
LH: loop header
LB: loop body
LE: loop exit
PB: predicated region body
PF: predicated region fallthrough
CT: control target
= control target key end

     0   :  { %8 = vsyncpa [#allocation3], 0  ;;  %s455_s0 = inlined_call_operand.hbm [shape: bf16[16,128], index: 0, kind: input, shape index: {}]   ;;  %s456_s1 = inlined_call_operand.hbm [shape: bf16[128,128], index: 1, kind: input, shape index: {}]   ;;  %s457_s2 = inlined_call_operand.hbm [shape: f32[16,128], index: 2, kind: input, shape index: {}, may-alias: {2,3}]   ;;  %s458_s3 = inlined_call_operand.hbm [shape: f32[16,128], index: 3, kind: output, shape index: {}, may-alias: {2,3}]  }
   0x1   :  { %9 = vsyncpa [#allocation6], 0 }
   0x2   :  { %10 = vsyncpa [#allocation4], 0  ;;  %s364_s12 = smov [#allocation5]   ;;  %s365_s14 = smov [#allocation2]  }
   0x3   :  { %s28_s13 = sshll.u32 %s364_s12, 4  ;;  %s16_s15 = sshll.u32 %s365_s14, 4  ;;  %s29_s13 = int_to_ptr.vmem [resolvable:$true] %s28_s13  ;;  %s394_s15 = int_to_ptr.vmem [resolvable:$true] %s16_s15 }
   0x4   :  { %s270_s18 = scalar_lea.hbm %s456_s1, 1024 }
   0x5   :  { %p271_p0 = scmp.ne.s32.totalorder %s456_s1, %s270_s18  ;;  %p274_p1 = scmp.lt.u32.totalorder %s270_s18, %s456_s1 }
   0x7   :  { %p276_p2 = pnand %p274_p1, %p271_p0 }
   0x9   :  { %279 = shalt.err (!%p276_p2)
}
   0xa   :  { %s280_s23 = scalar_lea.vmem %s29_s13, 1024  ;;  %p285_p4 = scmp.lt.s32.totalorder %s29_s13, %s29_s13 }
   0xb   :  { %p281_p3 = scmp.ne.s32.totalorder %s29_s13, %s280_s23  ;;  %p286_p5 = scmp.lt.s32.totalorder %s280_s23, %s280_s23 }
   0xd   :  { %p287_p6 = por %p286_p5, %p285_p4 }
   0xf   :  { %p288_p7 = pnand %p287_p6, %p281_p3 }
  0x11   :  { %291 = shalt.err (!%p288_p7)
}
  0x12   :  { %s366_s24 = smov 64   ;;  %s367_s25 = smov 4  }
  0x13   :  { %34 = dma.hbm_to_vmem [thread:$0]  %s456_s1, 1024, %s29_s13, [#allocation6], %s366_s24, %s366_s24, %s367_s25  }
  0x14   :  { %s292_s30 = scalar_lea.hbm %s455_s0, 128 }
  0x15   :  { %p293_p8 = scmp.ne.s32.totalorder %s455_s0, %s292_s30  ;;  %p296_p9 = scmp.lt.u32.totalorder %s292_s30, %s455_s0 }
  0x17   :  { %p298_p10 = pnand %p296_p9, %p293_p8 }
  0x19   :  { %301 = shalt.err (!%p298_p10)
}
  0x1a   :  { %s302_s8 = scalar_lea.vmem %s394_s15, 128  ;;  %p307_p12 = scmp.lt.s32.totalorder %s394_s15, %s394_s15 }
  0x1b   :  { %p303_p11 = scmp.ne.s32.totalorder %s394_s15, %s302_s8  ;;  %p308_p13 = scmp.lt.s32.totalorder %s302_s8, %s302_s8 }
  0x1d   :  { %p309_p0 = por %p308_p13, %p307_p12 }
  0x1f   :  { %p310_p1 = pnand %p309_p0, %p303_p11 }
  0x21   :  { %313 = shalt.err (!%p310_p1)
}
  0x22   :  { %22 = dma.hbm_to_vmem [thread:$0]  %s455_s0, 128, %s394_s15, [#allocation3], %s366_s24, %s366_s24, %s367_s25  }
  0x23   :  { %s368_s10 = smov [#allocation7]   ;;  %s314_s14 = scalar_lea.hbm %s457_s2, 256 }
  0x24   :  { %s40_s11 = sshll.u32 %s368_s10, 4  ;;  %p315_p2 = scmp.ne.s32.totalorder %s457_s2, %s314_s14  ;;  %s41_s11 = int_to_ptr.vmem [resolvable:$true] %s40_s11 }
  0x25   :  { %p318_p3 = scmp.lt.u32.totalorder %s314_s14, %s457_s2 }
  0x27   :  { %p320_p4 = pnand %p318_p3, %p315_p2 }
  0x29   :  { %323 = shalt.err (!%p320_p4)
}
  0x2a   :  { %s324_s20 = scalar_lea.vmem %s41_s11, 256  ;;  %p329_p6 = scmp.lt.s32.totalorder %s41_s11, %s41_s11 }
  0x2b   :  { %p325_p5 = scmp.ne.s32.totalorder %s41_s11, %s324_s20  ;;  %p330_p7 = scmp.lt.s32.totalorder %s324_s20, %s324_s20 }
  0x2d   :  { %p331_p8 = por %p330_p7, %p329_p6 }
  0x2f   :  { %p332_p9 = pnand %p331_p8, %p325_p5 }
  0x31   :  { %335 = shalt.err (!%p332_p9)
}
  0x32   :  { %s369_s0 = smov 128   ;;  %s370_s15 = smov 8  }
  0x33   :  { %46 = dma.hbm_to_vmem [thread:$0]  %s457_s2, 256, %s41_s11, [#allocation6], %s369_s0, %s369_s0, %s370_s15  }
  0x34   :  { %358 = dma.done.wait [#allocation3], 128  }
  0x35   :  { %359 = vsyncadd [#allocation3], 4294967168 }
  0x36   :  { %360 = dma.done.wait [#allocation6], 1280  }
  0x37   :  { %361 = vsyncadd [#allocation6], 4294966016  ;;  %v371_v0 = vmov 0.0   ;;  %vm372_vm0 = vmmov 0   ;;  %v261_v1 = vld [vmem:[#allocation5] sm:$0xff]   ;;  %v262_v2 = vld [vmem:[#allocation5 + $0x8] sm:$0xff]  }
  0x38   :  { %231 = vmatprep.subr.bf16.mxu0 %v371_v0  ;;  %247 = vmatprep.mubr.msk.bf16.mxu0 %vm372_vm0, %v371_v0  ;;  %v263_v3 = vld [vmem:[#allocation5 + $0x10] sm:$0xff]   ;;  %v264_v4 = vld [vmem:[#allocation5 + $0x18] sm:$0xff]   ;;  %v265_v5 = vld [vmem:[#allocation5 + $0x20] sm:$0xff]   ;;  %s373_s2 = smov [#allocation8]  }
  0x39   :  { %232 = vmatpush3.bf16.msra.mxu0 %v261_v1  ;;  %v266_v6 = vld [vmem:[#allocation5 + $0x28] sm:$0xff]   ;;  %v267_v7 = vld [vmem:[#allocation5 + $0x30] sm:$0xff]   ;;  %v268_v8 = vld [vmem:[#allocation5 + $0x38] sm:$0xff]   ;;  %s200_s23 = sshll.u32 %s373_s2, 4  ;;  %s201_s23 = int_to_ptr.vmem [resolvable:$true] %s200_s23 }
  0x3a   :  { %233 = vmatprep.subr.bf16.mxu0 %v371_v0  ;;  %v269_v9 = vld [vmem:[#allocation2] sm:$0xff]   ;;  %v185_v10 = vld [vmem:[#allocation7] sm:$0xff]  ;;  %v186_v11 = vld [vmem:[#allocation7 + $0x8] sm:$0xff]  ;;  %s336_s24 = scalar_lea.vmem %s201_s23, 256  ;;  %p341_p11 = scmp.lt.s32.totalorder %s201_s23, %s201_s23 }
  0x3b   :  { %v187_v12 = vmax.f32 %v185_v10, 0.0001  ;;  %v188_v15 = vmax.f32 %v186_v11, 0.0001  ;;  %p337_p10 = scmp.ne.s32.totalorder %s201_s23, %s336_s24  ;;  %p342_p12 = scmp.lt.s32.totalorder %s336_s24, %s336_s24 }
  0x3d   :  { %234 = vmatpush3.bf16.msra.mxu0 %v262_v2  ;;  %p343_p13 = por %p342_p12, %p341_p11 }
  0x3e   :  { %235 = vmatprep.subr.bf16.mxu0 %v371_v0 }
  0x3f   :  { %p344_p0 = pnand %p343_p13, %p337_p10 }
  0x41   :  { %236 = vmatpush3.bf16.msra.mxu0 %v263_v3 }
  0x42   :  { %237 = vmatprep.subr.bf16.mxu0 %v371_v0 }
  0x45   :  { %238 = vmatpush3.bf16.msra.mxu0 %v264_v4 }
  0x46   :  { %239 = vmatprep.subr.bf16.mxu0 %v371_v0 }
  0x49   :  { %240 = vmatpush3.bf16.msra.mxu0 %v265_v5 }
  0x4a   :  { %241 = vmatprep.subr.bf16.mxu0 %v371_v0 }
  0x4d   :  { %242 = vmatpush3.bf16.msra.mxu0 %v266_v6 }
  0x4e   :  { %243 = vmatprep.subr.bf16.mxu0 %v371_v0 }
  0x51   :  { %244 = vmatpush3.bf16.msra.mxu0 %v267_v7 }
  0x52   :  { %245 = vmatprep.subr.bf16.mxu0 %v371_v0 }
  0x55   :  { %246 = vmatpush3.bf16.msra.mxu0 %v268_v8 }
  0x58   :  { %248 = vmatmul.mubr.bf16.vlgmr.msra.gmra.mrb[0].mxu0 %v269_v9 }
 0x12b   :  { %v171_v13 = vpop.f32.mrb[0].mxu0 }
 0x12c   :  { %v249_v14 = vpop.f32.mrb[1].mxu0  ;;  %v191_v18 = vmul.f32 %v187_v12, %v171_v13 }
 0x12d   :  { %v174_v16 = vpop.f32.mrb[2].mxu0 }
 0x12e   :  { %v250_v17 = vpop.f32.mrb[3].mxu0  ;;  %v192_v19 = vmul.f32 %v188_v15, %v174_v16  ;;  %193 = vst [vmem:[#allocation8] sm:$0xff] %v191_v18 }
 0x130   :  { %194 = vst [vmem:[#allocation8 + $0x8] sm:$0xff] %v192_v19 }
 0x131   :  { %347 = shalt.err (!%p344_p0)
}
 0x132   :  { %s348_s27 = scalar_lea.hbm %s458_s3, 256 }
 0x133   :  { %p349_p1 = scmp.ne.s32.totalorder %s458_s3, %s348_s27  ;;  %p352_p2 = scmp.lt.u32.totalorder %s348_s27, %s458_s3 }
 0x135   :  { %p354_p3 = pnand %p352_p2, %p349_p1 }
 0x137   :  { %357 = shalt.err (!%p354_p3)
}
 0x138   :  { %206 = dma.vmem_to_hbm [thread:$0]  %s201_s23, 256, %s458_s3, [#allocation4], %s369_s0, %s369_s0, %s370_s15  }
 0x139   :  { %362 = dma.done.wait [#allocation4], 256  }
 0x13a   :  { %363 = vsyncadd [#allocation4], 4294967040 }
 0x13b   :  { %210 = vsyncpa [#allocation3], 1 }
 0x13c   :  { %211 = vsyncpa [#allocation6], 1 }
 0x13d   :  { %212 = vsyncpa [#allocation4], 1 }

</bundles_post_ra>
